<compile_context>
chip_gen: v6e
topology: v6e:2x2x1
jax: 0.10.0
libtpu: 0.0.40
codegen_flags: <defaults>
</compile_context>

<pallas_src>
import functools

import jax
import jax.numpy as jnp
from jax.experimental import pallas as pl
from jax.experimental.pallas import tpu as pltpu


def _round_up(x: int, m: int) -> int:
    return ((x + m - 1) // m) * m


_GELU_C = 0.7978845608028654  # sqrt(2 / pi)


def _encoder_kernel(ac_ref, w1_ref, b1_ref, w2_ref, b2_ref, o_ref):
    # ac_ref : (TM, D_in)      w1_ref : (D_in, 4H)    b1_ref : (1, 4H)
    # w2_ref : (4H, H)         b2_ref : (1, H)        o_ref  : (TM, H)

    # ac_encoder: Linear(D_in -> 4H).
    h = (jnp.dot(ac_ref[...], w1_ref[...], preferred_element_type=jnp.float32)
         + b1_ref[...])

    # GELU (tanh approximation, exactly as in the PyTorch module), f32.
    h2 = h * h
    g = 0.5 * h * (1.0 + jnp.tanh(_GELU_C * h * (1.0 + 0.044715 * h2)))

    # item_encoder: Linear(4H -> H).
    out = jnp.dot(g, w2_ref[...], preferred_element_type=jnp.float32) + b2_ref[...]
    o_ref[...] = out.astype(o_ref.dtype)


@functools.partial(jax.jit, static_argnames=("hidden_dim",))
def advanced_item_encoder_fwd(tokens, icontexts, ifeature_table,
                              w1, b1, w2, b2, *, hidden_dim):
    B, S = tokens.shape
    F = ifeature_table.shape[1]
    C = icontexts.shape[-1]
    H4 = w1.shape[1]
    D_in = F + C
    M = B * S

    # Embedding lookup (frozen ifeature_cache) -- glue in plain JAX; the concat
    # fuses into the gather output so no extra HBM pass is introduced.
    ifeats = jnp.take(ifeature_table, tokens, axis=0).reshape(M, F)
    ac = jnp.concatenate(
        [ifeats.astype(jnp.float32),
         icontexts.reshape(M, C).astype(jnp.float32)], axis=-1)      # (M, D_in)

    w1f = w1.astype(jnp.float32)                                      # (D_in, 4H)
    b1r = b1.reshape(1, H4).astype(jnp.float32)
    w2f = w2.astype(jnp.float32)                                      # (4H, H)
    b2r = b2.reshape(1, hidden_dim).astype(jnp.float32)

    # Row tiling: large tiles to amortize per-grid-step overhead, but at least
    # two grid steps (whenever M > 8) so both v7x TensorCores are used.
    TM_MAX = 2048
    TM = max(8, min(TM_MAX, _round_up(pl.cdiv(M, 2), 8)))
    M_pad = _round_up(M, TM)
    if M_pad != M:
        ac = jnp.pad(ac, ((0, M_pad - M), (0, 0)))
    grid = (M_pad // TM,)

    out2d = pl.pallas_call(
        _encoder_kernel,
        out_shape=jax.ShapeDtypeStruct((M_pad, hidden_dim), jnp.float32),
        grid_spec=pltpu.PrefetchScalarGridSpec(
            num_scalar_prefetch=0,
            grid=grid,
            in_specs=[
                pl.BlockSpec((TM, D_in), lambda i: (i, 0)),        # activations
                pl.BlockSpec((D_in, H4), lambda i: (0, 0)),        # w1 (resident)
                pl.BlockSpec((1, H4), lambda i: (0, 0)),           # b1 (resident)
                pl.BlockSpec((H4, hidden_dim), lambda i: (0, 0)),  # w2 (resident)
                pl.BlockSpec((1, hidden_dim), lambda i: (0, 0)),   # b2 (resident)
            ],
            out_specs=pl.BlockSpec((TM, hidden_dim), lambda i: (i, 0)),
        ),
        compiler_params=pltpu.CompilerParams(
            dimension_semantics=("parallel",),
            vmem_limit_bytes=32 * 1024 * 1024,
        ),
    )(ac, w1f, b1r, w2f, b2r)

    if M_pad != M:
        out2d = out2d[:M]                 # only when M is not tile-aligned
    return out2d.reshape(B, S, hidden_dim)


if __name__ == "__main__":
    # Small, deterministic synthetic configuration.
    num_items = 10
    ifeature_dim = 12
    icontext_dim = 4
    hidden_dim = 32
    B, S = 2, 8
    vocab_size = num_items + 1          # num_known_item is None

    key = jax.random.PRNGKey(0)
    k_feat, k_tok, k_ctx, k_w1, k_b1, k_w2, k_b2 = jax.random.split(key, 7)

    # Frozen item-feature embedding table (ifeature_cache).
    ifeature_table = jax.random.normal(k_feat, (vocab_size, ifeature_dim),
                                       dtype=jnp.float32)

    # Inputs.
    tokens = jax.random.randint(k_tok, (B, S), 0, vocab_size, dtype=jnp.int32)
    icontexts = jax.random.normal(k_ctx, (B, S, icontext_dim), dtype=jnp.float32)

    # Parameters (PyTorch Linear weight is (out, in); stored transposed (in, out)).
    D_in = ifeature_dim + icontext_dim
    w1 = jax.random.normal(k_w1, (D_in, hidden_dim * 4), dtype=jnp.float32) * 0.05
    b1 = jax.random.normal(k_b1, (hidden_dim * 4,), dtype=jnp.float32) * 0.05
    w2 = jax.random.normal(k_w2, (hidden_dim * 4, hidden_dim), dtype=jnp.float32) * 0.05
    b2 = jax.random.normal(k_b2, (hidden_dim,), dtype=jnp.float32) * 0.05

    out = advanced_item_encoder_fwd(tokens, icontexts, ifeature_table,
                                    w1, b1, w2, b2, hidden_dim=hidden_dim)
    out = jax.block_until_ready(out)

    # Pure-JAX reference check of the fused kernel.
    ifeats = jnp.take(ifeature_table, tokens, axis=0)
    ac = jnp.concatenate([ifeats, icontexts], axis=-1)
    h = ac @ w1 + b1
    g = 0.5 * h * (1.0 + jnp.tanh(jnp.sqrt(2.0 / jnp.pi) * (h + 0.044715 * h ** 3)))
    ref = g @ w2 + b2
    assert out.shape == (B, S, hidden_dim)
    assert jnp.allclose(out, ref, atol=1e-5, rtol=1e-5)

    print("KERNEL_OK")
</pallas_src>

<mosaic_0001>
module attributes {stable_mosaic.version = 11 : i64} {
  func.func @_encoder_kernel(%arg0: i32, %arg1: memref<8x16xf32, #tpu.memory_space<vmem>>, %arg2: memref<16x128xf32, #tpu.memory_space<vmem>>, %arg3: memref<1x128xf32, #tpu.memory_space<vmem>>, %arg4: memref<128x32xf32, #tpu.memory_space<vmem>>, %arg5: memref<1x32xf32, #tpu.memory_space<vmem>>, %arg6: memref<8x32xf32, #tpu.memory_space<vmem>>) attributes {dimension_semantics = [#tpu.dimension_semantics<parallel>], iteration_bounds = array<i64: 2>, scalar_prefetch = 0 : i64, scratch_operands = 0 : i64, tpu.core_type = #tpu.core_type<tc>, window_params = [{transform_indices = @transform_0, window_bounds = array<i64: 8, 16>}, {pipeline_mode = #tpu.pipeline_mode<synchronous>, transform_indices = @transform_1, window_bounds = array<i64: 16, 128>}, {pipeline_mode = #tpu.pipeline_mode<synchronous>, transform_indices = @transform_2, window_bounds = array<i64: 1, 128>}, {pipeline_mode = #tpu.pipeline_mode<synchronous>, transform_indices = @transform_3, window_bounds = array<i64: 128, 32>}, {pipeline_mode = #tpu.pipeline_mode<synchronous>, transform_indices = @transform_4, window_bounds = array<i64: 1, 32>}, {transform_indices = @transform_5, window_bounds = array<i64: 8, 32>}]} {
    %c0 = arith.constant 0 : index
    %c0_0 = arith.constant 0 : index
    %0 = vector.load %arg1[%c0, %c0_0] : memref<8x16xf32, #tpu.memory_space<vmem>>, vector<8x16xf32>
    %c0_1 = arith.constant 0 : index
    %c0_2 = arith.constant 0 : index
    %1 = vector.load %arg2[%c0_1, %c0_2] : memref<16x128xf32, #tpu.memory_space<vmem>>, vector<16x128xf32>
    %cst = arith.constant dense<0.000000e+00> : vector<8x128xf32>
    %2 = tpu.matmul %0, %1, %cst {dimension_numbers = #tpu.dot_dimension_numbers<[1], [0], [0], [1], [0, 0, 1, 1], [], []>} : vector<8x16xf32>, vector<16x128xf32>, vector<8x128xf32> -> vector<8x128xf32>
    %c0_3 = arith.constant 0 : index
    %c0_4 = arith.constant 0 : index
    %3 = vector.load %arg3[%c0_3, %c0_4] : memref<1x128xf32, #tpu.memory_space<vmem>>, vector<1x128xf32>
    %4 = vector.broadcast %3 : vector<1x128xf32> to vector<8x128xf32>
    %5 = arith.addf %2, %4 : vector<8x128xf32>
    %6 = arith.mulf %5, %5 : vector<8x128xf32>
    %cst_5 = arith.constant 5.000000e-01 : f32
    %7 = vector.broadcast %cst_5 : f32 to vector<8x128xf32>
    %8 = arith.mulf %7, %5 : vector<8x128xf32>
    %cst_6 = arith.constant 0.797884583 : f32
    %9 = vector.broadcast %cst_6 : f32 to vector<8x128xf32>
    %10 = arith.mulf %9, %5 : vector<8x128xf32>
    %cst_7 = arith.constant 4.471500e-02 : f32
    %11 = vector.broadcast %cst_7 : f32 to vector<8x128xf32>
    %12 = arith.mulf %11, %6 : vector<8x128xf32>
    %cst_8 = arith.constant 1.000000e+00 : f32
    %13 = vector.broadcast %cst_8 : f32 to vector<8x128xf32>
    %14 = arith.addf %13, %12 : vector<8x128xf32>
    %15 = arith.mulf %10, %14 : vector<8x128xf32>
    %16 = math.tanh %15 : vector<8x128xf32>
    %cst_9 = arith.constant 1.000000e+00 : f32
    %17 = vector.broadcast %cst_9 : f32 to vector<8x128xf32>
    %18 = arith.addf %17, %16 : vector<8x128xf32>
    %19 = arith.mulf %8, %18 : vector<8x128xf32>
    %c0_10 = arith.constant 0 : index
    %c0_11 = arith.constant 0 : index
    %20 = vector.load %arg4[%c0_10, %c0_11] : memref<128x32xf32, #tpu.memory_space<vmem>>, vector<128x32xf32>
    %cst_12 = arith.constant dense<0.000000e+00> : vector<8x32xf32>
    %21 = tpu.matmul %19, %20, %cst_12 {dimension_numbers = #tpu.dot_dimension_numbers<[1], [0], [0], [1], [0, 0, 1, 1], [], []>} : vector<8x128xf32>, vector<128x32xf32>, vector<8x32xf32> -> vector<8x32xf32>
    %c0_13 = arith.constant 0 : index
    %c0_14 = arith.constant 0 : index
    %22 = vector.load %arg5[%c0_13, %c0_14] : memref<1x32xf32, #tpu.memory_space<vmem>>, vector<1x32xf32>
    %23 = vector.broadcast %22 : vector<1x32xf32> to vector<8x32xf32>
    %24 = arith.addf %21, %23 : vector<8x32xf32>
    %c0_15 = arith.constant 0 : index
    %c0_16 = arith.constant 0 : index
    %25 = vector.load %arg6[%c0_15, %c0_16] : memref<8x32xf32, #tpu.memory_space<vmem>>, vector<8x32xf32>
    tpu.vector_store %arg6[%c0_15, %c0_16], %24 {strides = array<i32>} : memref<8x32xf32, #tpu.memory_space<vmem>>, vector<8x32xf32>,
    return
  }
  func.func @transform_0(%arg0: i32) -> (i32, i32) {
    %c0_i32 = arith.constant 0 : i32
    %c0_i32_0 = arith.constant 0 : i32
    return %arg0, %c0_i32 : i32, i32
  }
  func.func @transform_1(%arg0: i32) -> (i32, i32) {
    %c0_i32 = arith.constant 0 : i32
    %c0_i32_0 = arith.constant 0 : i32
    %c0_i32_1 = arith.constant 0 : i32
    return %c0_i32, %c0_i32_0 : i32, i32
  }
  func.func @transform_2(%arg0: i32) -> (i32, i32) {
    %c0_i32 = arith.constant 0 : i32
    %c0_i32_0 = arith.constant 0 : i32
    %c0_i32_1 = arith.constant 0 : i32
    return %c0_i32, %c0_i32_0 : i32, i32
  }
  func.func @transform_3(%arg0: i32) -> (i32, i32) {
    %c0_i32 = arith.constant 0 : i32
    %c0_i32_0 = arith.constant 0 : i32
    %c0_i32_1 = arith.constant 0 : i32
    return %c0_i32, %c0_i32_0 : i32, i32
  }
  func.func @transform_4(%arg0: i32) -> (i32, i32) {
    %c0_i32 = arith.constant 0 : i32
    %c0_i32_0 = arith.constant 0 : i32
    %c0_i32_1 = arith.constant 0 : i32
    return %c0_i32, %c0_i32_0 : i32, i32
  }
  func.func @transform_5(%arg0: i32) -> (i32, i32) {
    %c0_i32 = arith.constant 0 : i32
    %c0_i32_0 = arith.constant 0 : i32
    return %arg0, %c0_i32 : i32, i32
  }
}

</mosaic_0001>

<bundles_post_ra>
// kernel: advanced_item_encoder_fwd.1
= control target key start
LH: loop header
LB: loop body
LE: loop exit
PB: predicated region body
PF: predicated region fallthrough
CT: control target
= control target key end

     0   :  { %10 = vsyncpa [#allocation3], 0  ;;  %s847_s0 = inlined_call_operand.vmem [shape: f32[16,16], index: 0, kind: input, shape index: {}]   ;;  %s848_s1 = inlined_call_operand.vmem [shape: f32[16,128], index: 1, kind: input, shape index: {}]   ;;  %s849_s2 = inlined_call_operand.vmem [shape: f32[1,128], index: 2, kind: input, shape index: {}]   ;;  %s850_s3 = inlined_call_operand.vmem [shape: f32[128,32], index: 3, kind: input, shape index: {}]   ;;  %s851_s4 = inlined_call_operand.vmem [shape: f32[1,32], index: 4, kind: input, shape index: {}]   ;;  %s852_s5 = inlined_call_operand.hbm [shape: f32[16,32], index: 5, kind: output, shape index: {}]  }
   0x1   :  { %12 = vsyncpa [#allocation3 + $0x1], 0  ;;  %s694_s18 = smov 0   ;;  %s696_s19 = smov 0  }
   0x2   :  { %s698_s20 = smov 0   ;;  %s700_s21 = smov 0  }
   0x3 LB: > { %s715_s22 = sadd.s32 4294967295, %s659_s21   ;;  %s481_s23 = sadd.s32 4294967294, %s659_s21   ;;  %s659_s21 = sphi %s700_s21, %s858_s21   ;;  %s655_s20 = sphi %s698_s20, %s857_s20   ;;  %s651_s19 = sphi %s696_s19, %s856_s19   ;;  %s647_s18 = sphi %s694_s18, %s855_s18  }
   0x4   : > { %s719_s24 = sadd.s32 1, %s659_s21   ;;  %s135_s25 = sadd.s32 1, %s655_s20 }
   0x5   : > { %s132_s26 = ssub.s32 %s659_s21, %s719_s24  ;;  %p145_p0 = scmp.ne.s32.totalorder %s655_s20, %s651_s19 }
   0x6   : > { %p133_p1 = scmp.eq.s32.totalorder %s132_s26, 0  ;;  %p146_p2 = scmp.eq.s32.totalorder %s715_s22, 1 }
   0x7   : > { %p151_p3 = scmp.ne.s32.totalorder %s651_s19, %s647_s18  ;;  %p152_p4 = scmp.eq.s32.totalorder %s481_s23, 1 }
   0x8   : > { %s730_s27 = scalar_select %p133_p1, %s655_s20, %s135_s25  }
   0x9   : > { %p732_p5 = por %p146_p2, %p145_p0  ;;  %p736_p6 = por %p152_p4, %p151_p3 }
   0xa   : > { %p484_p7 = scmp.ge.s32.totalorder %s659_s21, 1  ;;  %p189_p8 = scmp.lt.s32.totalorder %s659_s21, 3 }
   0xc   : > { %p190_p9 = pnand %p484_p7, %p189_p8 }
   0xd   : > { %p216_p10 = scmp.lt.s32.totalorder (!%p190_p9), %s715_s22, 1  ;;  %s213_s16 = sand.u32 (!%p190_p9), 1, %s651_s19  }
   0xe   : > { %193 = sbr.rel (%p190_p9) target bundleno = 453 (0x1c5), region = 40  ;;  %s485_s17 = sshll.u32 (!%p190_p9), %s213_s16, 3 }
   0xf   : > { %s491_s26 = sshll.u32 (!%p190_p9), %s715_s22, 7  ;;  %s215_s30 = scalar_lea.vmem (!%p190_p9), [#allocation2], %s485_s17 }
  0x10   : > { %s422_s6 = sshll.u32 (!%p190_p9), %s215_s30, 4  ;;  %s812_s9 = scalar_lea.hbm (!%p190_p9), %s852_s5, %s491_s26  ;;  %s423_s6 = int_to_ptr.vmem [resolvable:$true] %s422_s6 }
  0x11   : > { %s409_s10 = scalar_lea.sflag (!%p190_p9), [#allocation3], %s213_s16 }
  0x13   : > { %v222_v0 = vld [vmem:[%s848_s1 + $0x8] sm:$0xff]  ;;  %v661_v1 = vmov 0.0   ;;  %v221_v2 = vld [vmem:[%s848_s1] sm:$0xff]  ;;  %vm662_vm0 = vmmov 0   ;;  %v328_v3 = vld [vmem:[%s850_s3 + $0x78] sm:$0xff]  ;;  %s217_s11 = scalar_select %p216_p10, %s715_s22, 1 }
  0x14   : > { %514 = vmatprep.subr.mxu0 %v661_v1  ;;  %518 = vmatprep.mubr.msk.f32.mxu0 %vm662_vm0, %v661_v1  ;;  %vm230_vm1 = vcmask 130048   ;;  %v327_v5 = vld [vmem:[%s850_s3 + $0x70] sm:$0xff]  ;;  %v326_v6 = vld [vmem:[%s850_s3 + $0x68] sm:$0xff]  ;;  %v325_v7 = vld [vmem:[%s850_s3 + $0x60] sm:$0xff]  ;;  %vm406_vm2 = vcmask 261120   ;;  %s663_s22 = smov [#allocation2]  }
  0x15   : > { %515 = vmatpush3.msra.mxu0 %v222_v0  ;;  %521 = vmatprep.subr.mxu1 %v661_v1  ;;  %s486_s12 = sshll.u32 %s217_s11, 3  ;;  %v324_v8 = vld [vmem:[%s850_s3 + $0x58] sm:$0xff]  ;;  %v323_v9 = vld [vmem:[%s850_s3 + $0x50] sm:$0xff]  ;;  %v322_v10 = vld [vmem:[%s850_s3 + $0x48] sm:$0xff]  ;;  %s599_s11 = scalar_lea.vmem %s423_s6, 128 }
  0x16   : > { %516 = vmatprep.subr.mxu0 %v661_v1  ;;  %522 = vmatpush3.msra.mxu1 %v328_v3  ;;  %s219_s15 = scalar_lea.vmem %s847_s0, %s486_s12  ;;  %v321_v11 = vld [vmem:[%s850_s3 + $0x40] sm:$0xff]  ;;  %v320_v12 = vld [vmem:[%s850_s3 + $0x38] sm:$0xff]  ;;  %v319_v13 = vld [vmem:[%s850_s3 + $0x30] sm:$0xff]  ;;  %p600_p11 = scmp.ne.s32.totalorder %s423_s6, %s599_s11 }
  0x17   : > { %517 = vmatpush3.msra.mxu0 %v221_v2  ;;  %523 = vmatprep.subr.mxu1 %v661_v1  ;;  %v220_v4 = vld [vmem:[%s219_s15] sm:$0xff]  ;;  %v318_v14 = vld [vmem:[%s850_s3 + $0x28] sm:$0xff]  ;;  %v316_v16 = vld [vmem:[%s850_s3 + $0x18] sm:$0xff]  ;;  %s603_s12 = sshll.u32 %s663_s22, 4  ;;  %s604_s12 = int_to_ptr.vmem [resolvable:$false] %s603_s12 }
  0x18   : > { %553 = vmatprep.mubr.msk.f32.mxu1 %vm662_vm0, %v661_v1  ;;  %519 = vmatmul.mubr.msk.f32.vlgmr.msra.gmra.mxu0 %vm230_vm1, %v220_v4  ;;  %v317_v15 = vld [vmem:[%s850_s3 + $0x20] sm:$0xff]  ;;  %v315_v17 = vld [vmem:[%s850_s3 + $0x10] sm:$0xff]  ;;  %v314_v18 = vld [vmem:[%s850_s3 + $0x8] sm:$0xff]  ;;  %p601_p12 = pnand %p600_p11, %p732_p5  ;;  %s605_s13 = scalar_lea.vmem %s604_s12, 256 }
  0x19   : > { %524 = vmatpush3.msra.mxu1 %v327_v5  ;;  %v313_v19 = vld [vmem:[%s850_s3] sm:$0xff]  ;;  %p606_p0 = scmp.lt.s32.totalorder %s423_s6, %s604_s12  ;;  %p607_p1 = scmp.lt.s32.totalorder %s605_s13, %s599_s11 }
  0x1a   : > { %525 = vmatprep.subr.mxu1 %v661_v1  ;;  %v487_v20 = vld [vmem:[%s849_s2] ss:$0 sm:$0xff]  ;;  %p602_p13 = pneg %p601_p12 }
  0x1b   : > { %526 = vmatpush3.msra.mxu1 %v326_v6  ;;  %v489_v33 = vld [vmem:[%s851_s4] ss:$0 sm:$0xff]  ;;  %p608_p2 = por %p607_p1, %p606_p0 }
  0x1c   : > { %527 = vmatprep.subr.mxu1 %v661_v1 }
  0x1d   : > { %528 = vmatpush3.msra.mxu1 %v325_v7  ;;  %p609_p3 = pnand %p608_p2, %p602_p13 }
  0x1e   : > { %529 = vmatprep.subr.mxu1 %v661_v1 }
  0x1f   : > { %530 = vmatpush3.msra.mxu1 %v324_v8 }
  0x20   : > { %531 = vmatprep.subr.mxu1 %v661_v1 }
  0x21   : > { %532 = vmatpush3.msra.mxu1 %v323_v9 }
  0x22   : > { %533 = vmatprep.subr.mxu1 %v661_v1 }
  0x23   : > { %534 = vmatpush3.msra.mxu1 %v322_v10 }
  0x24   : > { %535 = vmatprep.subr.mxu1 %v661_v1 }
  0x25   : > { %536 = vmatpush3.msra.mxu1 %v321_v11 }
  0x26   : > { %537 = vmatprep.subr.mxu1 %v661_v1 }
  0x27   : > { %538 = vmatpush3.msra.mxu1 %v320_v12 }
  0x28   : > { %539 = vmatprep.subr.mxu1 %v661_v1 }
  0x29   : > { %540 = vmatpush3.msra.mxu1 %v319_v13 }
  0x2a   : > { %541 = vmatprep.subr.mxu1 %v661_v1 }
  0x2b   : > { %542 = vmatpush3.msra.mxu1 %v318_v14 }
  0x2c   : > { %543 = vmatprep.subr.mxu1 %v661_v1 }
  0x2d   : > { %544 = vmatpush3.msra.mxu1 %v317_v15 }
  0x2e   : > { %545 = vmatprep.subr.mxu1 %v661_v1 }
  0x2f   : > { %546 = vmatpush3.msra.mxu1 %v316_v16 }
  0x30   : > { %547 = vmatprep.subr.mxu1 %v661_v1 }
  0x31   : > { %548 = vmatpush3.msra.mxu1 %v315_v17 }
  0x32   : > { %549 = vmatprep.subr.mxu1 %v661_v1 }
  0x33   : > { %550 = vmatpush3.msra.mxu1 %v314_v18 }
  0x34   : > { %551 = vmatprep.subr.mxu1 %v661_v1 }
  0x35   : > { %552 = vmatpush3.msra.mxu1 %v313_v19 }
  0xd8   : > { %v300_v21 = vpop.f32.mrf.mxu0 }
  0xd9   : > { %v301_v22 = vadd.f32 %v487_v20, %v300_v21 }
  0xda   : > { %v520_v23 = vpop.f32.mrf.mxu0 }
  0xdb   : > { %v304_v24 = vmul.f32 %v301_v22, %v301_v22  ;;  %v306_v26 = vmul.f32 0.7978846, %v301_v22  ;;  %v305_v30 = vmul.f32 0.5, %v301_v22 }
  0xdd   : > { %v307_v25 = vmul.f32 0.044715, %v304_v24 }
  0xdf   : > { %v308_v27 = vadd.f32 1.0, %v307_v25 }
  0xe1   : > { %v309_v28 = vmul.f32 %v308_v27, %v306_v26 }
  0xe3   : > { %597 = vtanh.f32 %v309_v28 }
  0xf0   : > { %v598_v29 = vpop.eup %597 }
  0xf1   : > { %v311_v31 = vadd.f32 1.0, %v598_v29 }
  0xf3   : > { %v312_v32 = vmul.f32 %v311_v31, %v305_v30 }
  0xf5   : > { %554 = vmatmul.mubr.f32.vlgmr.msra.gmra.mxu1 %v312_v32 }
 0x1b5   : > { %v402_v34 = vpop.f32.mrf.mxu1 }
 0x1b6   : > { %v403_v35 = vadd.f32 %v489_v33, %v402_v34 }
 0x1b7   : > { %v555_v36 = vpop.f32.mrf.mxu1 }
 0x1b8   : > { %407 = vst.msk [vmem:[%s215_s30] sm:$0xff] %vm406_vm2, %v403_v35 }
 0x1b9   : > { %612 = shalt.err (!%p609_p3)
}
 0x1ba   : > { %s613_s14 = scalar_lea.hbm %s812_s9, 128  ;;  %s617_s17 = scalar_lea.hbm %s852_s5, 256 }
 0x1bb   : > { %p614_p4 = scmp.ne.s32.totalorder %s812_s9, %s613_s14  ;;  %p618_p9 = scmp.lt.s32.totalorder %s812_s9, %s852_s5 }
 0x1bc   : > { %p619_p10 = scmp.lt.s32.totalorder %s617_s17, %s613_s14 }
 0x1bd   : > { %p615_p7 = pnand %p614_p4, %p732_p5 }
 0x1be   : > { %p620_p11 = por %p619_p10, %p618_p9 }
 0x1bf   : > { %p616_p8 = pneg %p615_p7 }
 0x1c1   : > { %p621_p12 = pnand %p620_p11, %p616_p8 }
 0x1c3   : > { %624 = shalt.err (!%p621_p12)
}
 0x1c4   : > { %556 = dma.vmem_to_hbm [thread:$0]  (%p732_p5), %s423_s6, 128, %s812_s9, %s409_s10  }
 0x1c5 PF: > { %p562_p13 = scmp.ge.s32.totalorder %s659_s21, 2  ;;  %s434_s26 = sand.u32 1, %s647_s18  }
 0x1c6   : > { %s435_s30 = scalar_lea.sflag [#allocation3], %s434_s26 }
 0x1c7   : > { %p559_p0 = pnand %p562_p13, %p736_p6 }
 0x1c9   : > { %p560_p1 = pneg %p559_p0 }
 0x1cb   : > { %642 = dma.done.wait (%p560_p1), %s435_s30, 128  }
 0x1cc   : > { %644 = vsyncadd (%p560_p1), %s435_s30, 4294967168  ;;  %p15_p2 = scmp.ge.s32.totalorder %s719_s24, 4   ;;  %s855_s18 = smov %s651_s19 }
 0x1cd   : > { %s856_s19 = smov %s655_s20  ;;  %s857_s20 = smov %s730_s27 }
 0x1ce   : > { %s858_s21 = smov %s719_s24  ;;  %17 = sbr.rel (!%p15_p2) target bundleno = 3 (0x3), region = 75 }
 0x1d3   :  { %440 = vsyncpa [#allocation3], 1 }
 0x1d4   :  { %442 = vsyncpa [#allocation3 + $0x1], 1 }

</bundles_post_ra>
